<compile_context>
chip_gen: v5e
topology: v5e:2x2
jax: 0.10.0
libtpu: 0.0.40
codegen_flags: <defaults>
</compile_context>

<pallas_src>
import functools
import math

import jax
import jax.numpy as jnp
from jax import lax
from jax.experimental import pallas as pl
from jax.experimental.pallas import tpu as pltpu


def _largest_tile(total: int, target: int, align: int) -> int:
    """Largest divisor of `total` that is <= target and a multiple of `align`.
    Falls back to `total` (full dim), which Pallas always accepts."""
    if total <= target:
        return total
    t = (target // align) * align
    while t >= align:
        if total % t == 0:
            return t
        t -= align
    return total


# ---------------------------------------------------------------------------
# Kernel. Grid = (B, num_F_tiles).  The attention sub-layer + LN2 run at the
# first F-tile step; each grid step accumulates one F-tile of the FFN.
# ---------------------------------------------------------------------------
def transformer_block_kernel(
    x_ref,                       # (1, S, E) f32, blocked per batch element
    g1_ref, b1_ref,              # (1, E) f32   (resident VMEM)
    wqkv_ref, bqkv_ref,          # (E, 3E) bf16, (1, 3E) f32
    wo_ref, bo_ref,              # (E, E) bf16, (1, E) f32
    g2_ref, b2_ref,              # (1, E) f32
    w1_ref, bf1_ref,             # (E, TF) bf16, (1, TF) f32   (streamed F tile)
    w2_ref,                      # (TF, E) bf16                (streamed F tile)
    bf2_ref,                     # (1, E) f32   (resident VMEM)
    o_ref,                       # (1, S, E) f32
    attn_sc,                     # (S, E) f32  scratch: concat of head outputs
    resid_sc,                    # (S, E) f32  scratch: x + attention
    h2_sc,                       # (S, E) bf16 scratch: LN2(resid)
    acc_sc,                      # (S, E) f32  scratch: FFN accumulator
    *, num_heads: int, q_tile: int,
):
    eps = 1e-5
    kf = pl.program_id(1)
    nkf = pl.num_programs(1)

    def layer_norm(h, gamma, beta):
        mu = jnp.mean(h, axis=-1, keepdims=True)
        d = h - mu
        var = jnp.mean(d * d, axis=-1, keepdims=True)   # biased var (PyTorch LN)
        return d * lax.rsqrt(var + eps) * gamma + beta

    # ---- sublayer 1 (attention) + LN2: only on the first F-tile step ----
    @pl.when(kf == 0)
    def _attention():
        x = x_ref[0]                                   # (S, E) f32
        S, E = x.shape
        H = num_heads
        D = E // H

        h1 = layer_norm(x, g1_ref[0], b1_ref[0]).astype(jnp.bfloat16)
        qkv = jnp.dot(h1, wqkv_ref[...],
                      preferred_element_type=jnp.float32) + bqkv_ref[0]  # (S, 3E)

        scale = jnp.float32(1.0 / math.sqrt(D))
        q = qkv[:, :E] * scale                         # fold 1/sqrt(D) into q
        k = qkv[:, E:2 * E].astype(jnp.bfloat16)
        v = qkv[:, 2 * E:].astype(jnp.bfloat16)

        # Per-head attention on 2-D lane slices, query-tiled to bound the
        # transient (tq, S) score tensor; outputs written straight into scratch.
        for h in range(H):
            kh = k[:, h * D:(h + 1) * D]               # (S, D) bf16
            vh = v[:, h * D:(h + 1) * D]               # (S, D) bf16
            qh = q[:, h * D:(h + 1) * D]               # (S, D) f32 (scaled)
            for t in range(S // q_tile):
                r0 = t * q_tile
                qt = qh[r0:r0 + q_tile].astype(jnp.bfloat16)      # (tq, D)
                s = lax.dot_general(qt, kh, (((1,), (1,)), ((), ())),
                                    preferred_element_type=jnp.float32)  # (tq, S)
                s = s - jnp.max(s, axis=-1, keepdims=True)
                p = jnp.exp(s)
                p = p * pl.reciprocal(jnp.sum(p, axis=-1, keepdims=True),
                                      approx=True)
                ho = jnp.dot(p.astype(jnp.bfloat16), vh,
                             preferred_element_type=jnp.float32)  # (tq, D)
                attn_sc[r0:r0 + q_tile, h * D:(h + 1) * D] = ho

        attn = jnp.dot(attn_sc[...].astype(jnp.bfloat16), wo_ref[...],
                       preferred_element_type=jnp.float32) + bo_ref[0]

        resid = x + attn                               # residual (dropout = id)
        resid_sc[...] = resid
        h2_sc[...] = layer_norm(resid, g2_ref[0], b2_ref[0]).astype(jnp.bfloat16)
        acc_sc[...] = jnp.zeros_like(acc_sc)

    # ---- sublayer 2 (FFN): one F tile per grid step, streamed weights ----
    f = jnp.dot(h2_sc[...], w1_ref[...],
                preferred_element_type=jnp.float32) + bf1_ref[0]   # (S, TF)
    # exact (erf-based) GELU, matching the reference
    f = 0.5 * f * (1.0 + lax.erf(f * jnp.float32(1.0 / math.sqrt(2.0))))
    acc_sc[...] += jnp.dot(f.astype(jnp.bfloat16), w2_ref[...],
                           preferred_element_type=jnp.float32)     # (S, E)

    @pl.when(kf == nkf - 1)
    def _finalize():
        o_ref[0] = resid_sc[...] + acc_sc[...] + bf2_ref[0]        # residual


# ---------------------------------------------------------------------------
# Wrapper
# ---------------------------------------------------------------------------
def transformer_block(x, params, *, num_heads):
    B, S, E = x.shape
    F = params["w1"].shape[1]

    TF = _largest_tile(F, 512, 128)   # FFN hidden tile streamed over the grid
    TQ = _largest_tile(S, 256, 8)     # in-kernel query tile
    NKF = F // TF

    bf16 = jnp.bfloat16
    f32 = jnp.float32

    # Fused QKV projection + bf16 weights prepared in the wrapper (half DMA).
    wqkv = jnp.concatenate(
        [params["wq"], params["wk"], params["wv"]], axis=1).astype(bf16)
    bqkv = jnp.concatenate(
        [params["bq"], params["bk"], params["bv"]], axis=1).astype(f32)
    wo = params["wo"].astype(bf16)
    w1 = params["w1"].astype(bf16)
    w2 = params["w2"].astype(bf16)

    # Constant operands: full-array resident in VMEM (no pipeline double-buffer).
    vmem_full = pl.BlockSpec(memory_space=pltpu.MemorySpace.VMEM)

    in_specs = [
        pl.BlockSpec((1, S, E), lambda b, k: (b, 0, 0)),   # x
        vmem_full, vmem_full,                              # ln1 gamma / beta
        vmem_full, vmem_full,                              # wqkv, bqkv
        vmem_full, vmem_full,                              # wo, bo
        vmem_full, vmem_full,                              # ln2 gamma / beta
        pl.BlockSpec((E, TF), lambda b, k: (0, k)),        # w1 tile (streamed)
        pl.BlockSpec((1, TF), lambda b, k: (0, k)),        # bf1 tile
        pl.BlockSpec((TF, E), lambda b, k: (k, 0)),        # w2 tile (streamed)
        vmem_full,                                         # bf2
    ]

    kernel = functools.partial(
        transformer_block_kernel, num_heads=num_heads, q_tile=TQ)

    # Per-generation VMEM budget: ~80% of physical (≈102 MiB v5e/v6e, ≈51 MiB v7x).
    try:
        vmem_cap = int(getattr(pltpu.get_tpu_info(), "vmem_capacity_bytes",
                               64 * 1024 * 1024))
    except Exception:  # pragma: no cover - conservative fallback
        vmem_cap = 64 * 1024 * 1024
    vmem_limit = max(32 * 1024 * 1024,
                     min(int(vmem_cap * 0.8), 112 * 1024 * 1024))

    return pl.pallas_call(
        kernel,
        out_shape=jax.ShapeDtypeStruct((B, S, E), jnp.float32),
        grid_spec=pltpu.PrefetchScalarGridSpec(
            num_scalar_prefetch=0,
            grid=(B, NKF),
            in_specs=in_specs,
            out_specs=pl.BlockSpec((1, S, E), lambda b, k: (b, 0, 0)),
            scratch_shapes=[
                pltpu.VMEM((S, E), f32),    # concat of per-head attention outputs
                pltpu.VMEM((S, E), f32),    # residual after attention
                pltpu.VMEM((S, E), bf16),   # LN2 output (MXU operand)
                pltpu.VMEM((S, E), f32),    # FFN accumulator
            ],
        ),
        compiler_params=pltpu.CompilerParams(
            dimension_semantics=("parallel", "arbitrary"),
            vmem_limit_bytes=vmem_limit,
        ),
    )(
        x,
        params["g1"], params["b1"],
        wqkv, bqkv,
        wo, params["bo"],
        params["g2"], params["b2"],
        w1, params["bf1"],
        w2, params["bf2"],
    )


# ---------------------------------------------------------------------------
# Pure-JAX reference (for verification; all f32)
# ---------------------------------------------------------------------------
def transformer_block_ref(x, p, *, num_heads):
    B, S, E = x.shape
    H = num_heads
    D = E // H
    eps = 1e-5

    def ln(h, g, b):
        mu = jnp.mean(h, axis=-1, keepdims=True)
        var = jnp.mean((h - mu) ** 2, axis=-1, keepdims=True)
        return (h - mu) / jnp.sqrt(var + eps) * g[0] + b[0]

    h1 = ln(x, p["g1"], p["b1"])
    q = h1 @ p["wq"] + p["bq"][0]
    k = h1 @ p["wk"] + p["bk"][0]
    v = h1 @ p["wv"] + p["bv"][0]
    q = q.reshape(B, S, H, D).transpose(0, 2, 1, 3)
    k = k.reshape(B, S, H, D).transpose(0, 2, 1, 3)
    v = v.reshape(B, S, H, D).transpose(0, 2, 1, 3)
    s = jnp.einsum("bhsd,bhtd->bhst", q, k) / math.sqrt(D)
    a = jax.nn.softmax(s, axis=-1)
    o = jnp.einsum("bhst,bhtd->bhsd", a, v).transpose(0, 2, 1, 3).reshape(B, S, E)
    o = o @ p["wo"] + p["bo"][0]
    x = x + o
    h2 = ln(x, p["g2"], p["b2"])
    f = h2 @ p["w1"] + p["bf1"][0]
    f = jax.nn.gelu(f, approximate=False)
    f = f @ p["w2"] + p["bf2"][0]
    return x + f


# ---------------------------------------------------------------------------
if __name__ == "__main__":
    B, S, E, H, FF = 2, 8, 32, 4, 64

    key = jax.random.PRNGKey(0)
    keys = jax.random.split(key, 16)

    def init(k, shape, scale=0.1):
        return (scale * jax.random.normal(k, shape)).astype(jnp.float32)

    params = {
        "g1": jnp.ones((1, E), jnp.float32),
        "b1": jnp.zeros((1, E), jnp.float32),
        "wq": init(keys[0], (E, E)), "bq": init(keys[1], (1, E)),
        "wk": init(keys[2], (E, E)), "bk": init(keys[3], (1, E)),
        "wv": init(keys[4], (E, E)), "bv": init(keys[5], (1, E)),
        "wo": init(keys[6], (E, E)), "bo": init(keys[7], (1, E)),
        "g2": jnp.ones((1, E), jnp.float32),
        "b2": jnp.zeros((1, E), jnp.float32),
        "w1": init(keys[8], (E, FF)), "bf1": init(keys[9], (1, FF)),
        "w2": init(keys[10], (FF, E)), "bf2": init(keys[11], (1, E)),
    }

    x = jax.random.normal(keys[12], (B, S, E), dtype=jnp.float32)

    out = transformer_block(x, params, num_heads=H)
    out = jax.block_until_ready(out)

    ref = transformer_block_ref(x, params, num_heads=H)
    assert out.shape == (B, S, E)
    # bf16 MXU operands with f32 accumulation + approx reciprocal: ~1e-3 error.
    assert jnp.allclose(out, ref, rtol=2e-2, atol=2e-2), (
        f"max abs err = {jnp.max(jnp.abs(out - ref))}")

    print("KERNEL_OK")
</pallas_src>

<mosaic_0001>
module attributes {stable_mosaic.version = 11 : i64} {
  func.func @transformer_block_kernel(%arg0: i32, %arg1: i32, %arg2: memref<1x8x32xf32, #tpu.memory_space<vmem>>, %arg3: memref<1x32xf32, #tpu.memory_space<vmem>>, %arg4: memref<1x32xf32, #tpu.memory_space<vmem>>, %arg5: memref<32x96xbf16, #tpu.memory_space<vmem>>, %arg6: memref<1x96xf32, #tpu.memory_space<vmem>>, %arg7: memref<32x32xbf16, #tpu.memory_space<vmem>>, %arg8: memref<1x32xf32, #tpu.memory_space<vmem>>, %arg9: memref<1x32xf32, #tpu.memory_space<vmem>>, %arg10: memref<1x32xf32, #tpu.memory_space<vmem>>, %arg11: memref<32x64xbf16, #tpu.memory_space<vmem>>, %arg12: memref<1x64xf32, #tpu.memory_space<vmem>>, %arg13: memref<64x32xbf16, #tpu.memory_space<vmem>>, %arg14: memref<1x32xf32, #tpu.memory_space<vmem>>, %arg15: memref<1x8x32xf32, #tpu.memory_space<vmem>>, %arg16: memref<8x32xf32, #tpu.memory_space<vmem>>, %arg17: memref<8x32xf32, #tpu.memory_space<vmem>>, %arg18: memref<8x32xbf16, #tpu.memory_space<vmem>>, %arg19: memref<8x32xf32, #tpu.memory_space<vmem>>) attributes {dimension_semantics = [#tpu.dimension_semantics<parallel>, #tpu.dimension_semantics<arbitrary>], iteration_bounds = array<i64: 2, 1>, scalar_prefetch = 0 : i64, scratch_operands = 4 : i64, tpu.core_type = #tpu.core_type<tc>, window_params = [{transform_indices = @transform_0, window_bounds = array<i64: 1, 8, 32>}, {pipeline_mode = #tpu.pipeline_mode<synchronous>, transform_indices = @transform_1, window_bounds = array<i64: 1, 32>}, {pipeline_mode = #tpu.pipeline_mode<synchronous>, transform_indices = @transform_2, window_bounds = array<i64: 1, 32>}, {pipeline_mode = #tpu.pipeline_mode<synchronous>, transform_indices = @transform_3, window_bounds = array<i64: 32, 96>}, {pipeline_mode = #tpu.pipeline_mode<synchronous>, transform_indices = @transform_4, window_bounds = array<i64: 1, 96>}, {pipeline_mode = #tpu.pipeline_mode<synchronous>, transform_indices = @transform_5, window_bounds = array<i64: 32, 32>}, {pipeline_mode = #tpu.pipeline_mode<synchronous>, transform_indices = @transform_6, window_bounds = array<i64: 1, 32>}, {pipeline_mode = #tpu.pipeline_mode<synchronous>, transform_indices = @transform_7, window_bounds = array<i64: 1, 32>}, {pipeline_mode = #tpu.pipeline_mode<synchronous>, transform_indices = @transform_8, window_bounds = array<i64: 1, 32>}, {transform_indices = @transform_9, window_bounds = array<i64: 32, 64>}, {transform_indices = @transform_10, window_bounds = array<i64: 1, 64>}, {transform_indices = @transform_11, window_bounds = array<i64: 64, 32>}, {pipeline_mode = #tpu.pipeline_mode<synchronous>, transform_indices = @transform_12, window_bounds = array<i64: 1, 32>}, {transform_indices = @transform_13, window_bounds = array<i64: 1, 8, 32>}]} {
    %c0_i32 = arith.constant 0 : i32
    %0 = arith.cmpi eq, %arg1, %c0_i32 : i32
    %1 = arith.extui %0 : i1 to i32
    %c0_i32_0 = arith.constant 0 : i32
    %2 = arith.cmpi ne, %1, %c0_i32_0 : i32
    scf.if %2 {
      %c0_18 = arith.constant 0 : index
      %c0_19 = arith.constant 0 : index
      %c0_20 = arith.constant 0 : index
      %28 = vector.load %arg2[%c0_18, %c0_19, %c0_20] : memref<1x8x32xf32, #tpu.memory_space<vmem>>, vector<1x8x32xf32>
      %29 = vector.shape_cast %28 : vector<1x8x32xf32> to vector<8x32xf32>
      %c0_21 = arith.constant 0 : index
      %c0_22 = arith.constant 0 : index
      %30 = vector.load %arg3[%c0_21, %c0_22] : memref<1x32xf32, #tpu.memory_space<vmem>>, vector<1x32xf32>
      %31 = vector.shape_cast %30 : vector<1x32xf32> to vector<32xf32>
      %c0_23 = arith.constant 0 : index
      %c0_24 = arith.constant 0 : index
      %32 = vector.load %arg4[%c0_23, %c0_24] : memref<1x32xf32, #tpu.memory_space<vmem>>, vector<1x32xf32>
      %33 = vector.shape_cast %32 : vector<1x32xf32> to vector<32xf32>
      %cst_25 = arith.constant dense<0.000000e+00> : vector<8xf32>
      %34 = vector.multi_reduction <add>, %29, %cst_25 [1] : vector<8x32xf32> to vector<8xf32>
      %35 = vector.shape_cast %34 : vector<8xf32> to vector<8x1xf32>
      %cst_26 = arith.constant 3.200000e+01 : f32
      %36 = vector.broadcast %cst_26 : f32 to vector<8x1xf32>
      %37 = arith.divf %35, %36 : vector<8x1xf32>
      %38 = vector.broadcast %37 : vector<8x1xf32> to vector<8x32xf32>
      %39 = arith.subf %29, %38 : vector<8x32xf32>
      %40 = arith.mulf %39, %39 : vector<8x32xf32>
      %cst_27 = arith.constant dense<0.000000e+00> : vector<8xf32>
      %41 = vector.multi_reduction <add>, %40, %cst_27 [1] : vector<8x32xf32> to vector<8xf32>
      %42 = vector.shape_cast %41 : vector<8xf32> to vector<8x1xf32>
      %cst_28 = arith.constant 3.200000e+01 : f32
      %43 = vector.broadcast %cst_28 : f32 to vector<8x1xf32>
      %44 = arith.divf %42, %43 : vector<8x1xf32>
      %cst_29 = arith.constant 9.99999974E-6 : f32
      %45 = vector.broadcast %cst_29 : f32 to vector<8x1xf32>
      %46 = arith.addf %44, %45 : vector<8x1xf32>
      %47 = math.rsqrt %46 : vector<8x1xf32>
      %48 = vector.broadcast %47 : vector<8x1xf32> to vector<8x32xf32>
      %49 = arith.mulf %39, %48 : vector<8x32xf32>
      %50 = vector.shape_cast %31 : vector<32xf32> to vector<1x32xf32>
      %51 = vector.broadcast %50 : vector<1x32xf32> to vector<8x32xf32>
      %52 = arith.mulf %49, %51 : vector<8x32xf32>
      %53 = vector.shape_cast %33 : vector<32xf32> to vector<1x32xf32>
      %54 = vector.broadcast %53 : vector<1x32xf32> to vector<8x32xf32>
      %55 = arith.addf %52, %54 : vector<8x32xf32>
      %56 = arith.truncf %55 : vector<8x32xf32> to vector<8x32xbf16>
      %c0_30 = arith.constant 0 : index
      %c0_31 = arith.constant 0 : index
      %57 = vector.load %arg5[%c0_30, %c0_31] : memref<32x96xbf16, #tpu.memory_space<vmem>>, vector<32x96xbf16>
      %cst_32 = arith.constant dense<0.000000e+00> : vector<8x96xf32>
      %58 = tpu.matmul %56, %57, %cst_32 {dimension_numbers = #tpu.dot_dimension_numbers<[1], [0], [0], [1], [0, 0, 1, 1], [], []>} : vector<8x32xbf16>, vector<32x96xbf16>, vector<8x96xf32> -> vector<8x96xf32>
      %c0_33 = arith.constant 0 : index
      %c0_34 = arith.constant 0 : index
      %59 = vector.load %arg6[%c0_33, %c0_34] : memref<1x96xf32, #tpu.memory_space<vmem>>, vector<1x96xf32>
      %60 = vector.shape_cast %59 : vector<1x96xf32> to vector<96xf32>
      %61 = vector.shape_cast %60 : vector<96xf32> to vector<1x96xf32>
      %62 = vector.broadcast %61 : vector<1x96xf32> to vector<8x96xf32>
      %63 = arith.addf %58, %62 : vector<8x96xf32>
      %64 = vector.extract_strided_slice %63 {offsets = [0, 0], sizes = [8, 32], strides = [1, 1]} : vector<8x96xf32> to vector<8x32xf32>
      %cst_35 = arith.constant 0.353553385 : f32
      %65 = vector.broadcast %cst_35 : f32 to vector<8x32xf32>
      %66 = arith.mulf %64, %65 : vector<8x32xf32>
      %67 = vector.extract_strided_slice %63 {offsets = [0, 32], sizes = [8, 32], strides = [1, 1]} : vector<8x96xf32> to vector<8x32xf32>
      %68 = arith.truncf %67 : vector<8x32xf32> to vector<8x32xbf16>
      %69 = vector.extract_strided_slice %63 {offsets = [0, 64], sizes = [8, 32], strides = [1, 1]} : vector<8x96xf32> to vector<8x32xf32>
      %70 = arith.truncf %69 : vector<8x32xf32> to vector<8x32xbf16>
      %71 = vector.extract_strided_slice %68 {offsets = [0, 0], sizes = [8, 8], strides = [1, 1]} : vector<8x32xbf16> to vector<8x8xbf16>
      %72 = vector.extract_strided_slice %70 {offsets = [0, 0], sizes = [8, 8], strides = [1, 1]} : vector<8x32xbf16> to vector<8x8xbf16>
      %73 = vector.extract_strided_slice %66 {offsets = [0, 0], sizes = [8, 8], strides = [1, 1]} : vector<8x32xf32> to vector<8x8xf32>
      %74 = arith.truncf %73 : vector<8x8xf32> to vector<8x8xbf16>
      %cst_36 = arith.constant dense<0.000000e+00> : vector<8x8xf32>
      %75 = tpu.matmul %74, %71, %cst_36 {dimension_numbers = #tpu.dot_dimension_numbers<[1], [1], [0], [0], [0, 0, 1, 0], [], []>} : vector<8x8xbf16>, vector<8x8xbf16>, vector<8x8xf32> -> vector<8x8xf32>
      %cst_37 = arith.constant dense<0xFF800000> : vector<8xf32>
      %76 = vector.multi_reduction <maximumf>, %75, %cst_37 [1] : vector<8x8xf32> to vector<8xf32>
      %77 = vector.shape_cast %76 : vector<8xf32> to vector<8x1xf32>
      %78 = vector.broadcast %77 : vector<8x1xf32> to vector<8x8xf32>
      %79 = arith.subf %75, %78 : vector<8x8xf32>
      %80 = math.exp %79 : vector<8x8xf32>
      %cst_38 = arith.constant dense<0.000000e+00> : vector<8xf32>
      %81 = vector.multi_reduction <add>, %80, %cst_38 [1] : vector<8x8xf32> to vector<8xf32>
      %82 = vector.shape_cast %81 : vector<8xf32> to vector<8x1xf32>
      %83 = tpu.reciprocal %82 {approx = true} : vector<8x1xf32> -> vector<8x1xf32>
      %84 = vector.broadcast %83 : vector<8x1xf32> to vector<8x8xf32>
      %85 = arith.mulf %80, %84 : vector<8x8xf32>
      %86 = arith.truncf %85 : vector<8x8xf32> to vector<8x8xbf16>
      %cst_39 = arith.constant dense<0.000000e+00> : vector<8x8xf32>
      %87 = tpu.matmul %86, %72, %cst_39 {dimension_numbers = #tpu.dot_dimension_numbers<[1], [0], [0], [1], [0, 0, 1, 1], [], []>} : vector<8x8xbf16>, vector<8x8xbf16>, vector<8x8xf32> -> vector<8x8xf32>
      %c0_40 = arith.constant 0 : index
      %c0_41 = arith.constant 0 : index
      %88 = vector.load %arg16[%c0_40, %c0_41] : memref<8x32xf32, #tpu.memory_space<vmem>>, vector<8x8xf32>
      tpu.vector_store %arg16[%c0_40, %c0_41], %87 {strides = array<i32>} : memref<8x32xf32, #tpu.memory_space<vmem>>, vector<8x8xf32>,
      %89 = vector.extract_strided_slice %68 {offsets = [0, 8], sizes = [8, 8], strides = [1, 1]} : vector<8x32xbf16> to vector<8x8xbf16>
      %90 = vector.extract_strided_slice %70 {offsets = [0, 8], sizes = [8, 8], strides = [1, 1]} : vector<8x32xbf16> to vector<8x8xbf16>
      %91 = vector.extract_strided_slice %66 {offsets = [0, 8], sizes = [8, 8], strides = [1, 1]} : vector<8x32xf32> to vector<8x8xf32>
      %92 = arith.truncf %91 : vector<8x8xf32> to vector<8x8xbf16>
      %cst_42 = arith.constant dense<0.000000e+00> : vector<8x8xf32>
      %93 = tpu.matmul %92, %89, %cst_42 {dimension_numbers = #tpu.dot_dimension_numbers<[1], [1], [0], [0], [0, 0, 1, 0], [], []>} : vector<8x8xbf16>, vector<8x8xbf16>, vector<8x8xf32> -> vector<8x8xf32>
      %cst_43 = arith.constant dense<0xFF800000> : vector<8xf32>
      %94 = vector.multi_reduction <maximumf>, %93, %cst_43 [1] : vector<8x8xf32> to vector<8xf32>
      %95 = vector.shape_cast %94 : vector<8xf32> to vector<8x1xf32>
      %96 = vector.broadcast %95 : vector<8x1xf32> to vector<8x8xf32>
      %97 = arith.subf %93, %96 : vector<8x8xf32>
      %98 = math.exp %97 : vector<8x8xf32>
      %cst_44 = arith.constant dense<0.000000e+00> : vector<8xf32>
      %99 = vector.multi_reduction <add>, %98, %cst_44 [1] : vector<8x8xf32> to vector<8xf32>
      %100 = vector.shape_cast %99 : vector<8xf32> to vector<8x1xf32>
      %101 = tpu.reciprocal %100 {approx = true} : vector<8x1xf32> -> vector<8x1xf32>
      %102 = vector.broadcast %101 : vector<8x1xf32> to vector<8x8xf32>
      %103 = arith.mulf %98, %102 : vector<8x8xf32>
      %104 = arith.truncf %103 : vector<8x8xf32> to vector<8x8xbf16>
      %cst_45 = arith.constant dense<0.000000e+00> : vector<8x8xf32>
      %105 = tpu.matmul %104, %90, %cst_45 {dimension_numbers = #tpu.dot_dimension_numbers<[1], [0], [0], [1], [0, 0, 1, 1], [], []>} : vector<8x8xbf16>, vector<8x8xbf16>, vector<8x8xf32> -> vector<8x8xf32>
      %c0_46 = arith.constant 0 : index
      %c8 = arith.constant 8 : index
      %106 = vector.load %arg16[%c0_46, %c8] : memref<8x32xf32, #tpu.memory_space<vmem>>, vector<8x8xf32>
      tpu.vector_store %arg16[%c0_46, %c8], %105 {strides = array<i32>} : memref<8x32xf32, #tpu.memory_space<vmem>>, vector<8x8xf32>,
      %107 = vector.extract_strided_slice %68 {offsets = [0, 16], sizes = [8, 8], strides = [1, 1]} : vector<8x32xbf16> to vector<8x8xbf16>
      %108 = vector.extract_strided_slice %70 {offsets = [0, 16], sizes = [8, 8], strides = [1, 1]} : vector<8x32xbf16> to vector<8x8xbf16>
      %109 = vector.extract_strided_slice %66 {offsets = [0, 16], sizes = [8, 8], strides = [1, 1]} : vector<8x32xf32> to vector<8x8xf32>
      %110 = arith.truncf %109 : vector<8x8xf32> to vector<8x8xbf16>
      %cst_47 = arith.constant dense<0.000000e+00> : vector<8x8xf32>
      %111 = tpu.matmul %110, %107, %cst_47 {dimension_numbers = #tpu.dot_dimension_numbers<[1], [1], [0], [0], [0, 0, 1, 0], [], []>} : vector<8x8xbf16>, vector<8x8xbf16>, vector<8x8xf32> -> vector<8x8xf32>
      %cst_48 = arith.constant dense<0xFF800000> : vector<8xf32>
      %112 = vector.multi_reduction <maximumf>, %111, %cst_48 [1] : vector<8x8xf32> to vector<8xf32>
      %113 = vector.shape_cast %112 : vector<8xf32> to vector<8x1xf32>
      %114 = vector.broadcast %113 : vector<8x1xf32> to vector<8x8xf32>
      %115 = arith.subf %111, %114 : vector<8x8xf32>
      %116 = math.exp %115 : vector<8x8xf32>
      %cst_49 = arith.constant dense<0.000000e+00> : vector<8xf32>
      %117 = vector.multi_reduction <add>, %116, %cst_49 [1] : vector<8x8xf32> to vector<8xf32>
      %118 = vector.shape_cast %117 : vector<8xf32> to vector<8x1xf32>
      %119 = tpu.reciprocal %118 {approx = true} : vector<8x1xf32> -> vector<8x1xf32>
      %120 = vector.broadcast %119 : vector<8x1xf32> to vector<8x8xf32>
      %121 = arith.mulf %116, %120 : vector<8x8xf32>
      %122 = arith.truncf %121 : vector<8x8xf32> to vector<8x8xbf16>
      %cst_50 = arith.constant dense<0.000000e+00> : vector<8x8xf32>
      %123 = tpu.matmul %122, %108, %cst_50 {dimension_numbers = #tpu.dot_dimension_numbers<[1], [0], [0], [1], [0, 0, 1, 1], [], []>} : vector<8x8xbf16>, vector<8x8xbf16>, vector<8x8xf32> -> vector<8x8xf32>
      %c0_51 = arith.constant 0 : index
      %c16 = arith.constant 16 : index
      %124 = vector.load %arg16[%c0_51, %c16] : memref<8x32xf32, #tpu.memory_space<vmem>>, vector<8x8xf32>
      tpu.vector_store %arg16[%c0_51, %c16], %123 {strides = array<i32>} : memref<8x32xf32, #tpu.memory_space<vmem>>, vector<8x8xf32>,
      %125 = vector.extract_strided_slice %68 {offsets = [0, 24], sizes = [8, 8], strides = [1, 1]} : vector<8x32xbf16> to vector<8x8xbf16>
      %126 = vector.extract_strided_slice %70 {offsets = [0, 24], sizes = [8, 8], strides = [1, 1]} : vector<8x32xbf16> to vector<8x8xbf16>
      %127 = vector.extract_strided_slice %66 {offsets = [0, 24], sizes = [8, 8], strides = [1, 1]} : vector<8x32xf32> to vector<8x8xf32>
      %128 = arith.truncf %127 : vector<8x8xf32> to vector<8x8xbf16>
      %cst_52 = arith.constant dense<0.000000e+00> : vector<8x8xf32>
      %129 = tpu.matmul %128, %125, %cst_52 {dimension_numbers = #tpu.dot_dimension_numbers<[1], [1], [0], [0], [0, 0, 1, 0], [], []>} : vector<8x8xbf16>, vector<8x8xbf16>, vector<8x8xf32> -> vector<8x8xf32>
      %cst_53 = arith.constant dense<0xFF800000> : vector<8xf32>
      %130 = vector.multi_reduction <maximumf>, %129, %cst_53 [1] : vector<8x8xf32> to vector<8xf32>
      %131 = vector.shape_cast %130 : vector<8xf32> to vector<8x1xf32>
      %132 = vector.broadcast %131 : vector<8x1xf32> to vector<8x8xf32>
      %133 = arith.subf %129, %132 : vector<8x8xf32>
      %134 = math.exp %133 : vector<8x8xf32>
      %cst_54 = arith.constant dense<0.000000e+00> : vector<8xf32>
      %135 = vector.multi_reduction <add>, %134, %cst_54 [1] : vector<8x8xf32> to vector<8xf32>
      %136 = vector.shape_cast %135 : vector<8xf32> to vector<8x1xf32>
      %137 = tpu.reciprocal %136 {approx = true} : vector<8x1xf32> -> vector<8x1xf32>
      %138 = vector.broadcast %137 : vector<8x1xf32> to vector<8x8xf32>
      %139 = arith.mulf %134, %138 : vector<8x8xf32>
      %140 = arith.truncf %139 : vector<8x8xf32> to vector<8x8xbf16>
      %cst_55 = arith.constant dense<0.000000e+00> : vector<8x8xf32>
      %141 = tpu.matmul %140, %126, %cst_55 {dimension_numbers = #tpu.dot_dimension_numbers<[1], [0], [0], [1], [0, 0, 1, 1], [], []>} : vector<8x8xbf16>, vector<8x8xbf16>, vector<8x8xf32> -> vector<8x8xf32>
      %c0_56 = arith.constant 0 : index
      %c24 = arith.constant 24 : index
      %142 = vector.load %arg16[%c0_56, %c24] : memref<8x32xf32, #tpu.memory_space<vmem>>, vector<8x8xf32>
      tpu.vector_store %arg16[%c0_56, %c24], %141 {strides = array<i32>} : memref<8x32xf32, #tpu.memory_space<vmem>>, vector<8x8xf32>,
      %c0_57 = arith.constant 0 : index
      %c0_58 = arith.constant 0 : index
      %143 = vector.load %arg16[%c0_57, %c0_58] : memref<8x32xf32, #tpu.memory_space<vmem>>, vector<8x32xf32>
      %144 = arith.truncf %143 : vector<8x32xf32> to vector<8x32xbf16>
      %c0_59 = arith.constant 0 : index
      %c0_60 = arith.constant 0 : index
      %145 = vector.load %arg7[%c0_59, %c0_60] : memref<32x32xbf16, #tpu.memory_space<vmem>>, vector<32x32xbf16>
      %cst_61 = arith.constant dense<0.000000e+00> : vector<8x32xf32>
      %146 = tpu.matmul %144, %145, %cst_61 {dimension_numbers = #tpu.dot_dimension_numbers<[1], [0], [0], [1], [0, 0, 1, 1], [], []>} : vector<8x32xbf16>, vector<32x32xbf16>, vector<8x32xf32> -> vector<8x32xf32>
      %c0_62 = arith.constant 0 : index
      %c0_63 = arith.constant 0 : index
      %147 = vector.load %arg8[%c0_62, %c0_63] : memref<1x32xf32, #tpu.memory_space<vmem>>, vector<1x32xf32>
      %148 = vector.shape_cast %147 : vector<1x32xf32> to vector<32xf32>
      %149 = vector.shape_cast %148 : vector<32xf32> to vector<1x32xf32>
      %150 = vector.broadcast %149 : vector<1x32xf32> to vector<8x32xf32>
      %151 = arith.addf %146, %150 : vector<8x32xf32>
      %152 = arith.addf %29, %151 : vector<8x32xf32>
      %c0_64 = arith.constant 0 : index
      %c0_65 = arith.constant 0 : index
      %153 = vector.load %arg17[%c0_64, %c0_65] : memref<8x32xf32, #tpu.memory_space<vmem>>, vector<8x32xf32>
      tpu.vector_store %arg17[%c0_64, %c0_65], %152 {strides = array<i32>} : memref<8x32xf32, #tpu.memory_space<vmem>>, vector<8x32xf32>,
      %c0_66 = arith.constant 0 : index
      %c0_67 = arith.constant 0 : index
      %154 = vector.load %arg9[%c0_66, %c0_67] : memref<1x32xf32, #tpu.memory_space<vmem>>, vector<1x32xf32>
      %155 = vector.shape_cast %154 : vector<1x32xf32> to vector<32xf32>
      %c0_68 = arith.constant 0 : index
      %c0_69 = arith.constant 0 : index
      %156 = vector.load %arg10[%c0_68, %c0_69] : memref<1x32xf32, #tpu.memory_space<vmem>>, vector<1x32xf32>
      %157 = vector.shape_cast %156 : vector<1x32xf32> to vector<32xf32>
      %cst_70 = arith.constant dense<0.000000e+00> : vector<8xf32>
      %158 = vector.multi_reduction <add>, %152, %cst_70 [1] : vector<8x32xf32> to vector<8xf32>
      %159 = vector.shape_cast %158 : vector<8xf32> to vector<8x1xf32>
      %cst_71 = arith.constant 3.200000e+01 : f32
      %160 = vector.broadcast %cst_71 : f32 to vector<8x1xf32>
      %161 = arith.divf %159, %160 : vector<8x1xf32>
      %162 = vector.broadcast %161 : vector<8x1xf32> to vector<8x32xf32>
      %163 = arith.subf %152, %162 : vector<8x32xf32>
      %164 = arith.mulf %163, %163 : vector<8x32xf32>
      %cst_72 = arith.constant dense<0.000000e+00> : vector<8xf32>
      %165 = vector.multi_reduction <add>, %164, %cst_72 [1] : vector<8x32xf32> to vector<8xf32>
      %166 = vector.shape_cast %165 : vector<8xf32> to vector<8x1xf32>
      %cst_73 = arith.constant 3.200000e+01 : f32
      %167 = vector.broadcast %cst_73 : f32 to vector<8x1xf32>
      %168 = arith.divf %166, %167 : vector<8x1xf32>
      %cst_74 = arith.constant 9.99999974E-6 : f32
      %169 = vector.broadcast %cst_74 : f32 to vector<8x1xf32>
      %170 = arith.addf %168, %169 : vector<8x1xf32>
      %171 = math.rsqrt %170 : vector<8x1xf32>
      %172 = vector.broadcast %171 : vector<8x1xf32> to vector<8x32xf32>
      %173 = arith.mulf %163, %172 : vector<8x32xf32>
      %174 = vector.shape_cast %155 : vector<32xf32> to vector<1x32xf32>
      %175 = vector.broadcast %174 : vector<1x32xf32> to vector<8x32xf32>
      %176 = arith.mulf %173, %175 : vector<8x32xf32>
      %177 = vector.shape_cast %157 : vector<32xf32> to vector<1x32xf32>
      %178 = vector.broadcast %177 : vector<1x32xf32> to vector<8x32xf32>
      %179 = arith.addf %176, %178 : vector<8x32xf32>
      %180 = arith.truncf %179 : vector<8x32xf32> to vector<8x32xbf16>
      %c0_75 = arith.constant 0 : index
      %c0_76 = arith.constant 0 : index
      %181 = vector.load %arg18[%c0_75, %c0_76] : memref<8x32xbf16, #tpu.memory_space<vmem>>, vector<8x32xbf16>
      tpu.vector_store %arg18[%c0_75, %c0_76], %180 {strides = array<i32>} : memref<8x32xbf16, #tpu.memory_space<vmem>>, vector<8x32xbf16>,
      %cst_77 = arith.constant 0.000000e+00 : f32
      %182 = vector.broadcast %cst_77 : f32 to vector<8x32xf32>
      %c0_78 = arith.constant 0 : index
      %c0_79 = arith.constant 0 : index
      %183 = vector.load %arg19[%c0_78, %c0_79] : memref<8x32xf32, #tpu.memory_space<vmem>>, vector<8x32xf32>
      tpu.vector_store %arg19[%c0_78, %c0_79], %182 {strides = array<i32>} : memref<8x32xf32, #tpu.memory_space<vmem>>, vector<8x32xf32>,
    } else {
    }
    %c0 = arith.constant 0 : index
    %c0_1 = arith.constant 0 : index
    %3 = vector.load %arg18[%c0, %c0_1] : memref<8x32xbf16, #tpu.memory_space<vmem>>, vector<8x32xbf16>
    %c0_2 = arith.constant 0 : index
    %c0_3 = arith.constant 0 : index
    %4 = vector.load %arg11[%c0_2, %c0_3] : memref<32x64xbf16, #tpu.memory_space<vmem>>, vector<32x64xbf16>
    %cst = arith.constant dense<0.000000e+00> : vector<8x64xf32>
    %5 = tpu.matmul %3, %4, %cst {dimension_numbers = #tpu.dot_dimension_numbers<[1], [0], [0], [1], [0, 0, 1, 1], [], []>} : vector<8x32xbf16>, vector<32x64xbf16>, vector<8x64xf32> -> vector<8x64xf32>
    %c0_4 = arith.constant 0 : index
    %c0_5 = arith.constant 0 : index
    %6 = vector.load %arg12[%c0_4, %c0_5] : memref<1x64xf32, #tpu.memory_space<vmem>>, vector<1x64xf32>
    %7 = vector.shape_cast %6 : vector<1x64xf32> to vector<64xf32>
    %8 = vector.shape_cast %7 : vector<64xf32> to vector<1x64xf32>
    %9 = vector.broadcast %8 : vector<1x64xf32> to vector<8x64xf32>
    %10 = arith.addf %5, %9 : vector<8x64xf32>
    %cst_6 = arith.constant 5.000000e-01 : f32
    %11 = vector.broadcast %cst_6 : f32 to vector<8x64xf32>
    %12 = arith.mulf %11, %10 : vector<8x64xf32>
    %cst_7 = arith.constant 0.707106769 : f32
    %13 = vector.broadcast %cst_7 : f32 to vector<8x64xf32>
    %14 = arith.mulf %10, %13 : vector<8x64xf32>
    %15 = math.erf %14 : vector<8x64xf32>
    %cst_8 = arith.constant 1.000000e+00 : f32
    %16 = vector.broadcast %cst_8 : f32 to vector<8x64xf32>
    %17 = arith.addf %16, %15 : vector<8x64xf32>
    %18 = arith.mulf %12, %17 : vector<8x64xf32>
    %c0_9 = arith.constant 0 : index
    %c0_10 = arith.constant 0 : index
    %19 = vector.load %arg19[%c0_9, %c0_10] : memref<8x32xf32, #tpu.memory_space<vmem>>, vector<8x32xf32>
    %20 = arith.truncf %18 : vector<8x64xf32> to vector<8x64xbf16>
    %c0_11 = arith.constant 0 : index
    %c0_12 = arith.constant 0 : index
    %21 = vector.load %arg13[%c0_11, %c0_12] : memref<64x32xbf16, #tpu.memory_space<vmem>>, vector<64x32xbf16>
    %cst_13 = arith.constant dense<0.000000e+00> : vector<8x32xf32>
    %22 = tpu.matmul %20, %21, %cst_13 {dimension_numbers = #tpu.dot_dimension_numbers<[1], [0], [0], [1], [0, 0, 1, 1], [], []>} : vector<8x64xbf16>, vector<64x32xbf16>, vector<8x32xf32> -> vector<8x32xf32>
    %23 = arith.addf %19, %22 : vector<8x32xf32>
    %c0_14 = arith.constant 0 : index
    %c0_15 = arith.constant 0 : index
    %24 = vector.load %arg19[%c0_14, %c0_15] : memref<8x32xf32, #tpu.memory_space<vmem>>, vector<8x32xf32>
    tpu.vector_store %arg19[%c0_14, %c0_15], %23 {strides = array<i32>} : memref<8x32xf32, #tpu.memory_space<vmem>>, vector<8x32xf32>,
    %c0_i32_16 = arith.constant 0 : i32
    %25 = arith.cmpi eq, %arg1, %c0_i32_16 : i32
    %26 = arith.extui %25 : i1 to i32
    %c0_i32_17 = arith.constant 0 : i32
    %27 = arith.cmpi ne, %26, %c0_i32_17 : i32
    scf.if %27 {
      %c0_18 = arith.constant 0 : index
      %c0_19 = arith.constant 0 : index
      %28 = vector.load %arg17[%c0_18, %c0_19] : memref<8x32xf32, #tpu.memory_space<vmem>>, vector<8x32xf32>
      %c0_20 = arith.constant 0 : index
      %c0_21 = arith.constant 0 : index
      %29 = vector.load %arg19[%c0_20, %c0_21] : memref<8x32xf32, #tpu.memory_space<vmem>>, vector<8x32xf32>
      %30 = arith.addf %28, %29 : vector<8x32xf32>
      %c0_22 = arith.constant 0 : index
      %c0_23 = arith.constant 0 : index
      %31 = vector.load %arg14[%c0_22, %c0_23] : memref<1x32xf32, #tpu.memory_space<vmem>>, vector<1x32xf32>
      %32 = vector.shape_cast %31 : vector<1x32xf32> to vector<32xf32>
      %33 = vector.shape_cast %32 : vector<32xf32> to vector<1x32xf32>
      %34 = vector.broadcast %33 : vector<1x32xf32> to vector<8x32xf32>
      %35 = arith.addf %30, %34 : vector<8x32xf32>
      %c0_24 = arith.constant 0 : index
      %c0_25 = arith.constant 0 : index
      %c0_26 = arith.constant 0 : index
      %36 = vector.load %arg15[%c0_24, %c0_25, %c0_26] : memref<1x8x32xf32, #tpu.memory_space<vmem>>, vector<1x8x32xf32>
      %37 = vector.shape_cast %36 : vector<1x8x32xf32> to vector<8x32xf32>
      %38 = vector.shape_cast %35 : vector<8x32xf32> to vector<1x8x32xf32>
      tpu.vector_store %arg15[%c0_24, %c0_25, %c0_26], %38 {strides = array<i32>} : memref<1x8x32xf32, #tpu.memory_space<vmem>>, vector<1x8x32xf32>,
    } else {
    }
    return
  }
  func.func @transform_0(%arg0: i32, %arg1: i32) -> (i32, i32, i32) {
    %c0_i32 = arith.constant 0 : i32
    %c0_i32_0 = arith.constant 0 : i32
    %c0_i32_1 = arith.constant 0 : i32
    return %arg0, %c0_i32, %c0_i32_0 : i32, i32, i32
  }
  func.func @transform_1(%arg0: i32, %arg1: i32) -> (i32, i32) {
    %c0_i32 = arith.constant 0 : i32
    %c0_i32_0 = arith.constant 0 : i32
    %c0_i32_1 = arith.constant 0 : i32
    return %c0_i32, %c0_i32_0 : i32, i32
  }
  func.func @transform_2(%arg0: i32, %arg1: i32) -> (i32, i32) {
    %c0_i32 = arith.constant 0 : i32
    %c0_i32_0 = arith.constant 0 : i32
    %c0_i32_1 = arith.constant 0 : i32
    return %c0_i32, %c0_i32_0 : i32, i32
  }
  func.func @transform_3(%arg0: i32, %arg1: i32) -> (i32, i32) {
    %c0_i32 = arith.constant 0 : i32
    %c0_i32_0 = arith.constant 0 : i32
    %c0_i32_1 = arith.constant 0 : i32
    return %c0_i32, %c0_i32_0 : i32, i32
  }
  func.func @transform_4(%arg0: i32, %arg1: i32) -> (i32, i32) {
    %c0_i32 = arith.constant 0 : i32
    %c0_i32_0 = arith.constant 0 : i32
    %c0_i32_1 = arith.constant 0 : i32
    return %c0_i32, %c0_i32_0 : i32, i32
  }
  func.func @transform_5(%arg0: i32, %arg1: i32) -> (i32, i32) {
    %c0_i32 = arith.constant 0 : i32
    %c0_i32_0 = arith.constant 0 : i32
    %c0_i32_1 = arith.constant 0 : i32
    return %c0_i32, %c0_i32_0 : i32, i32
  }
  func.func @transform_6(%arg0: i32, %arg1: i32) -> (i32, i32) {
    %c0_i32 = arith.constant 0 : i32
    %c0_i32_0 = arith.constant 0 : i32
    %c0_i32_1 = arith.constant 0 : i32
    return %c0_i32, %c0_i32_0 : i32, i32
  }
  func.func @transform_7(%arg0: i32, %arg1: i32) -> (i32, i32) {
    %c0_i32 = arith.constant 0 : i32
    %c0_i32_0 = arith.constant 0 : i32
    %c0_i32_1 = arith.constant 0 : i32
    return %c0_i32, %c0_i32_0 : i32, i32
  }
  func.func @transform_8(%arg0: i32, %arg1: i32) -> (i32, i32) {
    %c0_i32 = arith.constant 0 : i32
    %c0_i32_0 = arith.constant 0 : i32
    %c0_i32_1 = arith.constant 0 : i32
    return %c0_i32, %c0_i32_0 : i32, i32
  }
  func.func @transform_9(%arg0: i32, %arg1: i32) -> (i32, i32) {
    %c0_i32 = arith.constant 0 : i32
    %c0_i32_0 = arith.constant 0 : i32
    return %c0_i32, %arg1 : i32, i32
  }
  func.func @transform_10(%arg0: i32, %arg1: i32) -> (i32, i32) {
    %c0_i32 = arith.constant 0 : i32
    %c0_i32_0 = arith.constant 0 : i32
    return %c0_i32, %arg1 : i32, i32
  }
  func.func @transform_11(%arg0: i32, %arg1: i32) -> (i32, i32) {
    %c0_i32 = arith.constant 0 : i32
    %c0_i32_0 = arith.constant 0 : i32
    return %arg1, %c0_i32 : i32, i32
  }
  func.func @transform_12(%arg0: i32, %arg1: i32) -> (i32, i32) {
    %c0_i32 = arith.constant 0 : i32
    %c0_i32_0 = arith.constant 0 : i32
    %c0_i32_1 = arith.constant 0 : i32
    return %c0_i32, %c0_i32_0 : i32, i32
  }
  func.func @transform_13(%arg0: i32, %arg1: i32) -> (i32, i32, i32) {
    %c0_i32 = arith.constant 0 : i32
    %c0_i32_0 = arith.constant 0 : i32
    %c0_i32_1 = arith.constant 0 : i32
    return %arg0, %c0_i32, %c0_i32_0 : i32, i32, i32
  }
}

</mosaic_0001>

<bundles_post_ra>
// kernel: tpu_custom_call.1
= control target key start
LH: loop header
LB: loop body
LE: loop exit
PB: predicated region body
PF: predicated region fallthrough
CT: control target
= control target key end

     0   :  { %18 = vsyncpa [#allocation7], 0  ;;  %s1874_s0 = inlined_call_operand.vmem [shape: f32[2,8,32], index: 0, kind: input, shape index: {}]   ;;  %s1875_s1 = inlined_call_operand.hbm [shape: f32[1,32], index: 1, kind: input, shape index: {}]   ;;  %s1876_s2 = inlined_call_operand.vmem [shape: f32[1,32], index: 2, kind: input, shape index: {}]   ;;  %s1877_s3 = inlined_call_operand.vmem [shape: bf16[32,96], index: 3, kind: input, shape index: {}]   ;;  %s1878_s4 = inlined_call_operand.vmem [shape: f32[1,96], index: 4, kind: input, shape index: {}]   ;;  %s1879_s5 = inlined_call_operand.vmem [shape: bf16[32,32], index: 5, kind: input, shape index: {}]   ;;  %s1880_s6 = inlined_call_operand.vmem [shape: f32[1,32], index: 6, kind: input, shape index: {}]   ;;  %s1881_s7 = inlined_call_operand.vmem [shape: f32[1,32], index: 7, kind: input, shape index: {}]   ;;  %s1882_s8 = inlined_call_operand.vmem [shape: f32[1,32], index: 8, kind: input, shape index: {}]   ;;  %s1883_s9 = inlined_call_operand.hbm [shape: bf16[32,64], index: 9, kind: input, shape index: {}]   ;;  %s1884_s10 = inlined_call_operand.vmem [shape: f32[1,64], index: 10, kind: input, shape index: {}]   ;;  %s1885_s11 = inlined_call_operand.vmem [shape: bf16[64,32], index: 11, kind: input, shape index: {}]   ;;  %s1886_s12 = inlined_call_operand.vmem [shape: f32[1,32], index: 12, kind: input, shape index: {}]   ;;  %s1887_s13 = inlined_call_operand.hbm [shape: f32[2,8,32], index: 13, kind: output, shape index: {}]  }
   0x1   :  { %19 = vsyncpa [#allocation10], 0 }
   0x2   :  { %20 = vsyncpa [#allocation8], 0 }
   0x3   :  { %22 = vsyncpa [#allocation8 + $0x1], 0  ;;  %s1657_s25 = smov 0   ;;  %s1659_s26 = smov 0  }
   0x4   :  { %s1661_s27 = smov 0   ;;  %s1663_s28 = smov 0  }
   0x5   :  { %s1665_s29 = smov 0   ;;  %s1667_s30 = smov 0  }
   0x6 LB: > { %1892 = sst [smem:[#allocation15_spill]] %s1553_s27  ;;  %s1213_s14 = sadd.s32 4294967295, %s1565_s30   ;;  %s1565_s30 = sphi %s1667_s30, %s28_s30   ;;  %s1561_s29 = sphi %s1665_s29, %s1905_s29   ;;  %s1557_s28 = sphi %s1663_s28, %s1904_s28   ;;  %s1553_s27 = sphi %s1661_s27, %s1903_s27   ;;  %s1549_s26 = sphi %s1659_s26, %s1907_s26   ;;  %s1545_s25 = sphi %s1657_s25, %s1906_s25  }
   0x7   : > { %1893 = sst [smem:[#allocation16_spill]] %s1561_s29  ;;  %s1214_s15 = sadd.s32 4294967294, %s1565_s30  }
   0x8   : > { %s40_s16 = sadd.s32 1, %s1561_s29  ;;  %s340_s17 = sadd.s32 1, %s1553_s27 }
   0x9   : > { %p42_p0 = scmp.ge.s32.totalorder %s40_s16, 2  ;;  %p350_p1 = scmp.ne.s32.totalorder %s1553_s27, %s1549_s26 }
   0xa   : > { %p351_p2 = scmp.eq.s32.totalorder %s1213_s14, 1  ;;  %p356_p3 = scmp.ne.s32.totalorder %s1549_s26, %s1545_s25 }
   0xb   : > { %s1909_s16 = smov (%p42_p0, %s40_s16), 0  ;;  %p357_p5 = scmp.eq.s32.totalorder %s1214_s15, 1 }
   0xc   : > { %1894 = sst [smem:[#allocation17_spill]] %s1909_s16  ;;  %p1697_p4 = por %p351_p2, %p350_p1 }
   0xd   : > { %s337_s19 = ssub.s32 %s1561_s29, %s1909_s16  ;;  %p1215_p6 = scmp.ge.s32.totalorder %s1565_s30, 1 }
   0xe   : > { %p338_p7 = scmp.eq.s32.totalorder %s337_s19, 0  ;;  %p1704_p8 = por %p357_p5, %p356_p3 }
   0xf   : > { %p364_p9 = scmp.lt.s32.totalorder %s1565_s30, 3  ;;  %p1716_p11 = scmp.eq.s32.totalorder %s1213_s14, 0 }
  0x10   : > { %s1896_s20 = scalar_select %p1704_p8, 1, 0 }
  0x11   : > { %s1710_s21 = scalar_select %p338_p7, %s1553_s27, %s340_s17  }
  0x12   : > { %1897 = sst [smem:[#allocation18_spill]] %s1896_s20  ;;  %p1712_p10 = pnand %p1215_p6, %p364_p9 }
  0x13   : > { %1898 = sst [smem:[#allocation19_spill]] %s1710_s21  ;;  %s376_s19 = sshll.u32 %s1875_s1, 4  ;;  %s377_s19 = int_to_ptr.hbm [resolvable:$true] %s376_s19 }
  0x14   : > { %p1303_p12 = pneg %p1712_p10  ;;  %s1567_s16 = smov [#allocation6]  }
  0x15   : > { %s378_s17 = sshll.u32 %s1567_s16, 4  ;;  %s410_s27 = sshll.u32 %s1883_s9, 4  ;;  %s379_s17 = int_to_ptr.vmem [resolvable:$true] %s378_s17  ;;  %s411_s27 = int_to_ptr.hbm [resolvable:$true] %s410_s27 }
  0x16   : > { %p1304_p13 = pnand %p1716_p11, %p1303_p12  ;;  %s1568_s14 = smov [#allocation9]  }
  0x17   : > { %s412_s20 = sshll.u32 %s1568_s14, 4  ;;  %s1569_s24 = smov 64   ;;  %s413_s20 = int_to_ptr.vmem [resolvable:$true] %s412_s20 }
  0x18   : > { %1306 = dma.hbm_to_vmem [thread:$0]  (!%p1304_p13), %s377_s19, 16, %s379_s17, [#allocation7]  }
  0x19   : > { %s1570_s15 = smov 4   ;;  %453 = sbr.rel (%p1712_p10) target bundleno = 1976 (0x7b8), region = 72 }
  0x1a   : > { %1309 = dma.hbm_to_vmem [thread:$0]  (!%p1304_p13), %s411_s27, 256, %s413_s20, [#allocation10], %s1569_s24, %s1569_s24, %s1570_s15  }
  0x1e   : > { %1532 = dma.done.wait (%p1716_p11), [#allocation7], 16  }
  0x1f   : > { %1534 = vsyncadd (%p1716_p11), [#allocation7], 4294967280 }
  0x20   : > { %1536 = dma.done.wait (%p1716_p11), [#allocation10], 256  }
  0x21   : > { %1538 = vsyncadd (%p1716_p11), [#allocation10], 4294967040  ;;  %p510_p0 = scmp.lt.s32.totalorder %s1557_s28, 1  ;;  %vm531_vm0 = vcmask 261120   ;;  %v1571_v2 = vmov 32.0   ;;  %v1284_v14 = vld [vmem:[%s1877_s3 + $0x8] sm:$0xff] }
  0x22   : > { %1395 = vrcp.f32 %v1571_v2  ;;  %599 = vmatpush.bf16.msra.mxu0 %v1284_v14  ;;  %v1283_v15 = vld [vmem:[%s1877_s3] sm:$0xff]  ;;  %v1387_v25 = vld [vmem:[#allocation6] ss:$0 sm:$0xff]  ;;  %s1573_s16 = smov 120   ;;  %s1574_s20 = smov 96   ;;  %vm614_vm5 = vcmask 64512  }
  0x23   : > { %s511_s29 = scalar_select %p510_p0, %s1557_s28, 1  ;;  %v1388_v28 = vld [vmem:[%s1876_s2] ss:$0 sm:$0xff]  ;;  %vm651_vm6 = vcmask 1043456   ;;  %vm730_vm7 = vcmask 130112   ;;  %vm792_vm8 = vcmask 195712  }
  0x24   : > { %v1389_v32 = vld [vmem:[%s1878_s4] ss:$0 sm:$0xff]  ;;  %s1576_s22 = smov 88   ;;  %s1577_s23 = smov 112   ;;  %vm854_vm9 = vcmask 261312   ;;  %vm929_vm13 = vcmask 257024  }
  0x25   : > { %s1225_s27 = sshll.u32 %s511_s29, 3  ;;  %s1578_s19 = smov 80  }
  0x26   : > { %s513_s21 = scalar_lea.vmem %s1874_s0, %s1225_s27  ;;  %600 = vmatpush.bf16.msra.mxu0 %v1283_v15  ;;  %s1572_s27 = smov 104  }
  0x27   : > { %v1745_v0 = vld [vmem:[%s513_s21] sm:$0xff]  ;;  %s1575_s21 = smov 72   ;;  %s1579_s17 = smov 64  }
  0x28   : > { %v532_v1 = vsel %vm531_vm0, %v1745_v0, 0.0  ;;  %v1396_v3 = vpop.eup %1395  ;;  %s1580_s14 = smov 56   ;;  %s1581_s24 = smov 40  }
  0x29   : > { %533 = vadd.xlane.f32.xlu0 %v532_v1  ;;  %v536_v4 = vmul.f32 32.0, %v1396_v3  ;;  %vm540_vm1 = vweird.f32 %v1396_v3  ;;  %s1582_s15 = smov 48   ;;  %s1583_s29 = smov 8  }
  0x2b   : > { %v537_v5 = vsub.f32 1.0, %v536_v4 }
  0x2d   : > { %v538_v6 = vmul.f32 %v1396_v3, %v537_v5 }
  0x2f   : > { %v539_v7 = vadd.f32 %v1396_v3, %v538_v6 }
  0x31   : > { %v1749_v8 = vsel %vm540_vm1, %v1396_v3, %v539_v7 }
  0x9c   : > { %v534_v9 = vpop.xlane.xlu0 %533 }
  0x9d   : > { %v542_v10 = vmul.f32 %v1749_v8, %v534_v9 }
  0x9f   : > { %v543_v11 = vsub.f32 %v1745_v0, %v542_v10 }
  0xa1   : > { %v544_v12 = vmul.f32 %v543_v11, %v543_v11 }
  0xa3   : > { %v545_v13 = vsel %vm531_vm0, %v544_v12, 0.0 }
  0xa4   : > { %546 = vadd.xlane.f32.xlu0 %v545_v13 }
 0x117   : > { %v547_v16 = vpop.xlane.xlu0 %546 }
 0x118   : > { %v548_v17 = vmul.f32 %v547_v16, %v1749_v8 }
 0x11a   : > { %v549_v18 = vadd.f32 1e-05, %v548_v17 }
 0x11c   : > { %1397 = vrsqrt.f32 %v549_v18  ;;  %vm556_vm3 = vweird.f32 %v549_v18 }
 0x122   : > { %v1398_v19 = vpop.eup %1397 }
 0x123   : > { %v551_v20 = vmul.f32 %v1398_v19, %v549_v18  ;;  %vm557_vm2 = vweird.f32 %v1398_v19 }
 0x124   : > { %vm558_vm4 = vmor %vm556_vm3, %vm557_vm2  ;;  %vm1048_vm3 = vcmask 523264  }
 0x125   : > { %v552_v21 = vmul.f32 %v1398_v19, %v551_v20 }
 0x127   : > { %v553_v22 = vmul.f32 0.5, %v552_v21 }
 0x129   : > { %v554_v23 = vsub.f32 1.5, %v553_v22 }
 0x12b   : > { %v555_v24 = vmul.f32 %v1398_v19, %v554_v23 }
 0x12d   : > { %v559_v26 = vsel %vm558_vm4, %v1398_v19, %v555_v24 }
 0x12e   : > { %v560_v27 = vmul.f32 %v559_v26, %v543_v11 }
 0x130   : > { %v564_v29 = vmul.f32 %v1387_v25, %v560_v27 }
 0x132   : > { %v568_v30 = vadd.f32 %v1388_v28, %v564_v29 }
 0x134   : > { %v569_v31 = vpack.c.bf16 %v568_v30, %v568_v30 }
 0x136   : > { %1234 = vmatmul.msk.bf16.vlgmr.msra.gmra.mxu0 %vm531_vm0, %v569_v31 }
 0x1b3   : > { %v602_v33 = vpop.f32.mrf.mxu0 }
 0x1b4   : > { %v603_v34 = vadd.f32 %v1389_v32, %v602_v33 }
 0x1b6   : > { %v606_v35 = vmul.f32 0.35355338, %v603_v34  ;;  %v607_v36 = vpack.c.bf16 %v603_v34, %v603_v34 }
 0x1b8   : > { %v608_v37 = vpack.c.bf16 %v606_v35, %v606_v35  ;;  %v610_v38 = vunpack.c.l.b16 %v607_v36 }
 0x1ba   : > { %v611_v39 = vpack.c.b16 %v610_v38, %v610_v38  ;;  %794 = vrot.lane.b32.xlu0 %v608_v37, %s1572_s27  ;;  %670 = vrot.lane.b32.xlu2 %v608_v37, %s1573_s16  ;;  %s1584_s27 = smov 24   ;;  %s1585_s16 = smov 16  }
 0x1bb   : > { %v604_v40 = vpop.f32.mrf.mxu0 }
 0x1bc   : > { %612 = vrot.lane.b32.xlu1 %v611_v39, %s1574_s20 }
 0x1c2   : > { %796 = vrot.lane.b32.xlu2 %v611_v39, %s1575_s21 }
 0x1c4   : > { %672 = vrot.lane.b32.xlu1 %v611_v39, %s1576_s22 }
 0x1ca   : > { %732 = vrot.lane.b32.xlu2 %v608_v37, %s1577_s23 }
 0x1cc   : > { %734 = vrot.lane.b32.xlu1 %v611_v39, %s1578_s19 }
 0x214   : > { %v671_v41 = vpop.permute.xlu2 %670 }
 0x21c   : > { %v797_v44 = vpop.permute.xlu2 %796 }
 0x21d   : > { %v802_v47 = vsel %vm614_vm5, %v797_v44, 0 }
 0x224   : > { %v733_v50 = vpop.permute.xlu2 %732 }
 0x22c   : > { %v795_v51 = vpop.permute.xlu0 %794 }
 0x22e   : > { %v613_v42 = vpop.permute.xlu1 %612 }
 0x22f   : > { %v619_v43 = vsel %vm614_vm5, %v613_v42, 0 }
 0x230   : > { %628 = vmatpush.bf16.xpose.msra.mxu1 %v619_v43 }
 0x236   : > { %v673_v45 = vpop.permute.xlu1 %672 }
 0x237   : > { %1235 = vmatmul.msk.bf16.vlgmr.msra.gmra.mxu1 %vm614_vm5, %v608_v37  ;;  %v678_v46 = vsel %vm614_vm5, %v673_v45, 0 }
 0x238   : > { %687 = vmatpush.bf16.xpose.msra.mxu3 %v678_v46 }
 0x23e   : > { %v735_v48 = vpop.permute.xlu1 %734 }
 0x23f   : > { %1237 = vmatmul.msk.bf16.vlgmr.msra.gmra.mxu3 %vm614_vm5, %v671_v41  ;;  %v740_v49 = vsel %vm614_vm5, %v735_v48, 0 }
 0x240   : > { %811 = vmatpush.bf16.xpose.msrb.mxu3 %v802_v47  ;;  %749 = vmatpush.bf16.xpose.msrb.mxu0 %v740_v49 }
 0x247   : > { %1239 = vmatmul.msk.bf16.vlgmr.msrb.gmra.mxu0 %vm614_vm5, %v733_v50 }
 0x24f   : > { %1241 = vmatmul.msk.bf16.vlgmr.msrb.gmra.mxu3 %vm614_vm5, %v795_v51 }
 0x2b4   : > { %v630_v52 = vpop.f32.mrf.mxu1 }
 0x2b5   : > { %v634_v53 = vsel %vm614_vm5, %v630_v52, -inf }
 0x2b6   : > { %635 = vmax.xlane.f32.xlu1 %v634_v53 }
 0x2bc   : > { %v632_v54 = vpop.f32.mrf.mxu1 }
 0x2bd   : > { %v1286_v54 = vld [vmem:[%s1879_s5 + $0x8] sm:$0xff] }
 0x2be   : > { %887 = vmatpush.bf16.msra.mxu0 %v1286_v54 }
 0x2c2   : > { %v689_v55 = vpop.f32.mrf.mxu3 }
 0x2c3   : > { %v693_v56 = vsel %vm614_vm5, %v689_v55, -inf }
 0x2c4   : > { %694 = vmax.xlane.f32.xlu2 %v693_v56  ;;  %v751_v57 = vpop.f32.mrf.mxu0 }
 0x2c5   : > { %v755_v59 = vsel %vm614_vm5, %v751_v57, -inf }
 0x2ca   : > { %v691_v58 = vpop.f32.mrf.mxu3 }
 0x2cc   : > { %756 = vmax.xlane.f32.xlu2 %v755_v59  ;;  %v753_v60 = vpop.f32.mrf.mxu0 }
 0x2d2   : > { %v813_v61 = vpop.f32.mrf.mxu3 }
 0x2d3   : > { %v817_v62 = vsel %vm614_vm5, %v813_v61, -inf }
 0x2d4   : > { %818 = vmax.xlane.f32.xlu0 %v817_v62 }
 0x2da   : > { %v815_v63 = vpop.f32.mrf.mxu3 }
 0x2e4   : > { %646 = vrot.lane.b32.xlu2 %v611_v39, %s1579_s17 }
 0x2e8   : > { %705 = vrot.lane.b32.xlu0 %v611_v39, %s1580_s14 }
 0x2ec   : > { %829 = vrot.lane.b32.xlu2 %v611_v39, %s1581_s24 }
 0x2f0   : > { %767 = vrot.lane.b32.xlu0 %v611_v39, %s1582_s15  ;;  %s507_s15 = sand.u32 1, %s1549_s26  }
 0x329   : > { %v636_v1 = vpop.xlane.xlu1 %635 }
 0x32a   : > { %v637_v2 = vsub.f32 %v630_v52, %v636_v1 }
 0x32c   : > { %v638_v3 = vmul.f32 1.442695, %v637_v2 }
 0x32e   : > { %1399 = vpow2.f32 %v638_v3 }
 0x334   : > { %v1400_v4 = vpop.eup %1399 }
 0x335   : > { %v640_v5 = vsel %vm614_vm5, %v1400_v4, 0.0 }
 0x336   : > { %641 = vadd.xlane.f32.xlu1 %v640_v5 }
 0x337   : > { %v695_v6 = vpop.xlane.xlu2 %694 }
 0x338   : > { %v696_v7 = vsub.f32 %v689_v55, %v695_v6  ;;  %v1285_v55 = vld [vmem:[%s1879_s5] sm:$0xff] }
 0x339   : > { %888 = vmatpush.bf16.msra.mxu0 %v1285_v55 }
 0x33a   : > { %v697_v9 = vmul.f32 1.442695, %v696_v7 }
 0x33c   : > { %1401 = vpow2.f32 %v697_v9 }
 0x33f   : > { %v757_v10 = vpop.xlane.xlu2 %756 }
 0x340   : > { %v758_v17 = vsub.f32 %v751_v57, %v757_v10  ;;  %v1288_v10 = vld [vmem:[#allocation9 + $0x8] sm:$0xff] }
 0x342   : > { %v1402_v11 = vpop.eup %1401  ;;  %v759_v19 = vmul.f32 1.442695, %v758_v17 }
 0x343   : > { %v699_v12 = vsel %vm614_vm5, %v1402_v11, 0.0 }
 0x344   : > { %700 = vadd.xlane.f32.xlu1 %v699_v12 }
 0x347   : > { %v819_v13 = vpop.xlane.xlu0 %818  ;;  %v647_v14 = vpop.permute.xlu2 %646 }
 0x348   : > { %v820_v15 = vsub.f32 %v813_v61, %v819_v13  ;;  %v653_v16 = vsel %vm651_vm6, %v647_v14, 0  ;;  %v1390_v61 = vld [vmem:[%s1880_s6] ss:$0 sm:$0xff] }
 0x349   : > { %662 = vmatpush.bf16.msra.mxu2 %v653_v16 }
 0x34a   : > { %v821_v18 = vmul.f32 1.442695, %v820_v15 }
 0x34c   : > { %1403 = vpow2.f32 %v821_v18 }
 0x34d   : > { %1405 = vpow2.f32 %v759_v19 }
 0x34f   : > { %v830_v31 = vpop.permute.xlu2 %829 }
 0x350   : > { %v835_v33 = vsel %vm651_vm6, %v830_v31, 0 }
 0x352   : > { %v1404_v20 = vpop.eup %1403 }
 0x353   : > { %v823_v21 = vsel %vm614_vm5, %v1404_v20, 0.0  ;;  %v1406_v22 = vpop.eup %1405 }
 0x354   : > { %824 = vadd.xlane.f32.xlu1 %v823_v21  ;;  %v761_v25 = vsel %vm614_vm5, %v1406_v22, 0.0 }
 0x35a   : > { %v706_v23 = vpop.permute.xlu0 %705 }
 0x35b   : > { %v711_v24 = vsel %vm651_vm6, %v706_v23, 0 }
 0x35c   : > { %720 = vmatpush.bf16.msrb.mxu2 %v711_v24  ;;  %762 = vadd.xlane.f32.xlu1 %v761_v25 }
 0x362   : > { %v768_v26 = vpop.permute.xlu0 %767 }
 0x363   : > { %v773_v27 = vsel %vm651_vm6, %v768_v26, 0 }
 0x364   : > { %782 = vmatpush.bf16.msrb.mxu1 %v773_v27  ;;  %v1393_v27 = vld [vmem:[%s1884_s10] ss:$0 sm:$0xff] }
 0x368   : > { %963 = vmatpush.bf16.msra.mxu1 %v1288_v10 }
 0x3a9   : > { %v642_v28 = vpop.xlane.xlu1 %641 }
 0x3aa   : > { %1407 = vrcp.f32 %v642_v28 }
 0x3b0   : > { %v1408_v29 = vpop.eup %1407 }
 0x3b1   : > { %v644_v30 = vmul.f32 %v1408_v29, %v1400_v4 }
 0x3b3   : > { %v645_v32 = vpack.c.bf16 %v644_v30, %v644_v30 }
 0x3b5   : > { %1236 = vmatmul.msk.bf16.vlgmr.msra.gmra.mxu2 %vm614_vm5, %v645_v32 }
 0x3b6   : > { %844 = vmatpush.bf16.msra.mxu2 %v835_v33 }
 0x3b7   : > { %v701_v34 = vpop.xlane.xlu1 %700 }
 0x3b8   : > { %1409 = vrcp.f32 %v701_v34  ;;  %v1292_v34 = vld [vmem:[%s1885_s11 + $0x18] sm:$0xff] }
 0x3b9   : > { %1056 = vmatpush.bf16.msra.mxu3 %v1292_v34 }
 0x3be   : > { %v1410_v35 = vpop.eup %1409 }
 0x3bf   : > { %v703_v36 = vmul.f32 %v1410_v35, %v1402_v11 }
 0x3c1   : > { %v704_v37 = vpack.c.bf16 %v703_v36, %v703_v36 }
 0x3c5   : > { %1238 = vmatmul.msk.bf16.vlgmr.msrb.gmra.mxu2 %vm614_vm5, %v704_v37 }
 0x3c7   : > { %v825_v38 = vpop.xlane.xlu1 %824 }
 0x3c8   : > { %1411 = vrcp.f32 %v825_v38 }
 0x3ce   : > { %v1412_v39 = vpop.eup %1411 }
 0x3cf   : > { %v827_v40 = vmul.f32 %v1412_v39, %v1404_v20  ;;  %v763_v41 = vpop.xlane.xlu1 %762  ;;  %v1391_v20 = vld [vmem:[%s1881_s7] ss:$0 sm:$0xff]  ;;  %v1291_v39 = vld [vmem:[%s1885_s11 + $0x10] sm:$0xff] }
 0x3d0   : > { %1413 = vrcp.f32 %v763_v41  ;;  %1057 = vmatpush.bf16.msra.mxu3 %v1291_v39 }
 0x3d1   : > { %v828_v42 = vpack.c.bf16 %v827_v40, %v827_v40 }
 0x3d5   : > { %1242 = vmatmul.msk.bf16.vlgmr.msra.gmra.mxu2 %vm614_vm5, %v828_v42 }
 0x3d6   : > { %v1414_v43 = vpop.eup %1413 }
 0x3d7   : > { %v765_v44 = vmul.f32 %v1414_v43, %v1406_v22 }
 0x3d9   : > { %v766_v45 = vpack.c.bf16 %v765_v44, %v765_v44  ;;  %v1290_v44 = vld [vmem:[%s1885_s11 + $0x8] sm:$0xff] }
 0x3da   : > { %1058 = vmatpush.bf16.msra.mxu3 %v1290_v44 }
 0x3db   : > { %1240 = vmatmul.msk.bf16.vlgmr.msrb.gmra.mxu1 %vm614_vm5, %v766_v45 }
 0x438   : > { %v664_v46 = vpop.f32.mrf.mxu2 }
 0x439   : > { %668 = vst.msk [vmem:[#allocation2] sm:$0xff] %vm614_vm5, %v664_v46 }
 0x440   : > { %v666_v47 = vpop.f32.mrf.mxu2 }
 0x448   : > { %v722_v48 = vpop.f32.mrf.mxu2 }
 0x449   : > { %727 = vrot.lane.b32.xlu1 %v722_v48, %s1583_s29  ;;  %v1289_v48 = vld [vmem:[%s1885_s11] sm:$0xff]  ;;  %s1224_s29 = sshll.u32 %s507_s15, 3 }
 0x44a   : > { %1059 = vmatpush.bf16.msra.mxu3 %v1289_v48  ;;  %s509_s19 = scalar_lea.vmem [#allocation11], %s1224_s29  ;;  %s1499_s29 = scalar_lea.hbm %s1887_s13, 16 }
 0x44b   : > { %s1092_s17 = sshll.u32 %s509_s19, 4  ;;  %s1093_s17 = int_to_ptr.vmem [resolvable:$true] %s1092_s17 }
 0x450   : > { %v724_v49 = vpop.f32.mrf.mxu2 }
 0x458   : > { %v784_v50 = vpop.f32.mrf.mxu1  ;;  %v846_v51 = vpop.f32.mrf.mxu2 }
 0x459   : > { %851 = vrot.lane.b32.xlu0 %v846_v51, %s1584_s27  ;;  %789 = vrot.lane.b32.xlu2 %v784_v50, %s1585_s16  ;;  %s1280_s27 = sshll.u32 %s1557_s28, 3  ;;  %s1080_s28 = scalar_lea.sflag [#allocation8], %s507_s15 }
 0x45a   : > { %s1090_s21 = scalar_lea.hbm %s1887_s13, %s1280_s27 }
 0x45b   : > { %s1094_s14 = sshll.u32 %s1090_s21, 4  ;;  %s1095_s14 = int_to_ptr.hbm [resolvable:$true] %s1094_s14 }
 0x45c   : > { %s1493_s24 = sshra.s32 %s1095_s14, 4  ;;  %s1494_s24 = int_to_ptr.hbm [resolvable:$true] %s1493_s24 }
 0x45d   : > { %s1495_s27 = scalar_lea.hbm %s1494_s24, 8  ;;  %p1500_p5 = scmp.lt.s32.totalorder %s1494_s24, %s1887_s13 }
 0x45e   : > { %p1496_p1 = scmp.ne.s32.totalorder %s1494_s24, %s1495_s27  ;;  %p1501_p6 = scmp.lt.s32.totalorder %s1499_s29, %s1495_s27 }
 0x460   : > { %v786_v52 = vpop.f32.mrf.mxu1  ;;  %v848_v53 = vpop.f32.mrf.mxu2  ;;  %p1497_p2 = pnand %p1496_p1, %p1697_p4  ;;  %p1502_p7 = por %p1501_p6, %p1500_p5 }
 0x461   : > { %v1586_v53 = vmov 0.0  }
 0x462   : > { %931 = vst.msk [vmem:[#allocation5] sm:$0xff] %vm531_vm0, %v1586_v53  ;;  %p1498_p3 = pneg %p1497_p2 }
 0x464   : > { %p1503_p9 = pnand %p1502_p7, %p1498_p3 }
 0x4b3   : > { %v790_v57 = vpop.permute.xlu2 %789 }
 0x4bb   : > { %v728_v56 = vpop.permute.xlu1 %727 }
 0x4bc   : > { %731 = vst.msk [vmem:[#allocation2] sm:$0xff] %vm730_vm7, %v728_v56 }
 0x4bd   : > { %793 = vst.msk [vmem:[#allocation2] sm:$0xff] %vm792_vm8, %v790_v57 }
 0x4cb   : > { %v852_v58 = vpop.permute.xlu0 %851 }
 0x4cc   : > { %855 = vst.msk [vmem:[#allocation2] sm:$0xff] %vm854_vm9, %v852_v58 }
 0x4d3   : > { %v856_v59 = vld [vmem:[#allocation2] sm:$0xff] }
 0x4d4   : > { %v857_v60 = vpack.c.bf16 %v856_v59, %v856_v59 }
 0x4d6   : > { %1251 = vmatmul.msk.bf16.vlgmr.msra.gmra.mxu0 %vm531_vm0, %v857_v60 }
 0x553   : > { %v890_v62 = vpop.f32.mrf.mxu0 }
 0x554   : > { %v891_v63 = vadd.f32 %v1390_v61, %v890_v62 }
 0x556   : > { %v894_v1 = vadd.f32 %v891_v63, %v1745_v0  ;;  %v1287_v0 = vld [vmem:[#allocation9] sm:$0xff] }
 0x557   : > { %964 = vmatpush.bf16.msra.mxu1 %v1287_v0 }
 0x558   : > { %895 = vst.msk [vmem:[#allocation3] sm:$0xff] %vm531_vm0, %v894_v1  ;;  %v898_v2 = vsel %vm531_vm0, %v894_v1, 0.0 }
 0x559   : > { %899 = vadd.xlane.f32.xlu2 %v898_v2 }
 0x55b   : > { %v892_v3 = vpop.f32.mrf.mxu0 }
 0x5cc   : > { %v900_v4 = vpop.xlane.xlu2 %899 }
 0x5cd   : > { %v901_v5 = vmul.f32 %v900_v4, %v1749_v8 }
 0x5cf   : > { %v902_v6 = vsub.f32 %v894_v1, %v901_v5 }
 0x5d1   : > { %v903_v7 = vmul.f32 %v902_v6, %v902_v6 }
 0x5d3   : > { %v904_v9 = vsel %vm531_vm0, %v903_v7, 0.0 }
 0x5d4   : > { %905 = vadd.xlane.f32.xlu0 %v904_v9 }
 0x647   : > { %v906_v11 = vpop.xlane.xlu0 %905 }
 0x648   : > { %v907_v12 = vmul.f32 %v906_v11, %v1749_v8  ;;  %v1392_v8 = vld [vmem:[%s1882_s8] ss:$0 sm:$0xff] }
 0x64a   : > { %v908_v13 = vadd.f32 1e-05, %v907_v12 }
 0x64c   : > { %1415 = vrsqrt.f32 %v908_v13  ;;  %vm915_vm11 = vweird.f32 %v908_v13 }
 0x652   : > { %v1416_v14 = vpop.eup %1415 }
 0x653   : > { %v910_v15 = vmul.f32 %v1416_v14, %v908_v13  ;;  %vm916_vm10 = vweird.f32 %v1416_v14  ;;  %v1014_v13 = vld [vmem:[#allocation5] sm:$0xff] }
 0x654   : > { %vm917_vm12 = vmor %vm915_vm11, %vm916_vm10 }
 0x655   : > { %v911_v16 = vmul.f32 %v1416_v14, %v910_v15 }
 0x657   : > { %v912_v17 = vmul.f32 0.5, %v911_v16 }
 0x659   : > { %v913_v18 = vsub.f32 1.5, %v912_v17  ;;  %v1394_v17 = vld [vmem:[%s1886_s12] ss:$0 sm:$0xff] }
 0x65b   : > { %v914_v19 = vmul.f32 %v1416_v14, %v913_v18  ;;  %v1070_v18 = vld [vmem:[#allocation3] sm:$0xff] }
 0x65d   : > { %v918_v21 = vsel %vm917_vm12, %v1416_v14, %v914_v19 }
 0x65e   : > { %v919_v22 = vmul.f32 %v918_v21, %v902_v6 }
 0x660   : > { %v923_v23 = vmul.f32 %v1391_v20, %v919_v22 }
 0x662   : > { %v927_v24 = vadd.f32 %v1392_v8, %v923_v23 }
 0x664   : > { %v928_v25 = vpack.c.bf16 %v927_v24, %v927_v24 }
 0x666   : > { %930 = vst.msk [vmem:[#allocation4] sm:$0xf] %vm929_vm13, %v928_v25 }
 0x66d   : > { %v932_v26 = vld [vmem:[#allocation4] sm:$0xf] }
 0x66e   : > { %1260 = vmatmul.msk.bf16.vlgmr.msra.gmra.mxu1 %vm531_vm0, %v932_v26 }
 0x6eb   : > { %v966_v28 = vpop.f32.mrf.mxu1 }
 0x6ec   : > { %v967_v29 = vadd.f32 %v1393_v27, %v966_v28 }
 0x6ee   : > { %v971_v30 = vmul.f32 0.70710677, %v967_v29  ;;  %v970_v10 = vmul.f32 0.5, %v967_v29 }
 0x6f0   : > { %v972_v31 = vmul.f32 %v971_v30, %v971_v30 }
 0x6f2   : > { %v973_v32 = vmin.f32 %v972_v31, 16.0 }
 0x6f3   : > { %v968_v33 = vpop.f32.mrf.mxu1 }
 0x6f4   : > { %v974_v35 = vmul.f32 2.1237322e-06, %v973_v32  ;;  %v985_v36 = vmul.f32 3.8918573e-05, %v973_v32 }
 0x6f6   : > { %v975_v37 = vadd.f32 0.00028619796, %v974_v35  ;;  %v986_v38 = vadd.f32 0.001143296, %v985_v36 }
 0x6f8   : > { %v976_v40 = vmul.f32 %v975_v37, %v973_v32  ;;  %v987_v41 = vmul.f32 %v986_v38, %v973_v32 }
 0x6fa   : > { %v988_v42 = vadd.f32 0.014752088, %v987_v41  ;;  %v977_v43 = vadd.f32 0.0036580483, %v976_v40 }
 0x6fc   : > { %v989_v45 = vmul.f32 %v988_v42, %v973_v32  ;;  %v978_v47 = vmul.f32 %v977_v43, %v973_v32 }
 0x6fe   : > { %v990_v46 = vadd.f32 0.112945676, %v989_v45  ;;  %v979_v51 = vadd.f32 0.05243302, %v978_v47 }
 0x700   : > { %v991_v49 = vmul.f32 %v990_v46, %v973_v32  ;;  %v980_v55 = vmul.f32 %v979_v51, %v973_v32 }
 0x702   : > { %v992_v50 = vadd.f32 0.4994258, %v991_v49  ;;  %v981_v56 = vadd.f32 0.18741608, %v980_v55 }
 0x704   : > { %v993_v52 = vmul.f32 %v992_v50, %v973_v32  ;;  %v982_v58 = vmul.f32 %v981_v56, %v973_v32 }
 0x706   : > { %v994_v54 = vadd.f32 1.0, %v993_v52  ;;  %v983_v62 = vadd.f32 1.1283791, %v982_v58 }
 0x708   : > { %1417 = vrcp.f32 %v994_v54  ;;  %v1006_v61 = vand.u32 2147483648, %v994_v54  ;;  %v1004_v1 = vand.u32 2147483647, %v994_v54  ;;  %vm1000_vm15 = vweird.f32 %v994_v54 }
 0x709   : > { %v984_v4 = vmul.f32 %v983_v62, %v971_v30 }
 0x70a   : > { %v1007_v3 = vor.u32 1.1754944e-38, %v1006_v61  ;;  %vm1005_vm2 = vcmp.eq.f32.partialorder %v1004_v1, 8.507059e+37 }
 0x70e   : > { %v1418_v57 = vpop.eup %1417 }
 0x70f   : > { %v996_v59 = vmul.f32 %v1418_v57, %v994_v54  ;;  %vm1001_vm14 = vweird.f32 %v1418_v57 }
 0x710   : > { %vm1002_vm1 = vmor %vm1000_vm15, %vm1001_vm14 }
 0x711   : > { %v997_v60 = vsub.f32 1.0, %v996_v59 }
 0x713   : > { %v998_v63 = vmul.f32 %v1418_v57, %v997_v60 }
 0x715   : > { %v999_v2 = vadd.f32 %v1418_v57, %v998_v63 }
 0x717   : > { %v1003_v5 = vsel %vm1002_vm1, %v1418_v57, %v999_v2 }
 0x718   : > { %v1008_v6 = vsel %vm1005_vm2, %v1007_v3, %v1003_v5 }
 0x719   : > { %v1009_v7 = vmul.f32 %v1008_v6, %v984_v4 }
 0x71b   : > { %v1261_v9 = vclamps-f32 %v1009_v7, 1.0 }
 0x71d   : > { %v1012_v11 = vadd.f32 1.0, %v1261_v9 }
 0x71f   : > { %v1013_v12 = vmul.f32 %v1012_v11, %v970_v10 }
 0x721   : > { %v1015_v0 = vpack.c.bf16 %v1013_v12, %v1013_v12 }
 0x723   : > { %1278 = vmatmul.msk.bf16.vlgmr.msra.gmra.mxu3 %vm1048_vm3, %v1015_v0 }
 0x7a6   : > { %v1061_v14 = vpop.f32.mrf.mxu3 }
 0x7a7   : > { %v1065_v15 = vadd.f32 %v1061_v14, %v1014_v13 }
 0x7a9   : > { %1066 = vst.msk [vmem:[#allocation5] sm:$0xff] %vm531_vm0, %v1065_v15 }
 0x7ae   : > { %v1063_v16 = vpop.f32.mrf.mxu3 }
 0x7b0   : > { %v1071_v19 = vld [vmem:[#allocation5] sm:$0xff] }
 0x7b1   : > { %v1072_v20 = vadd.f32 %v1071_v19, %v1070_v18 }
 0x7b3   : > { %v1077_v21 = vadd.f32 %v1394_v17, %v1072_v20 }
 0x7b5   : > { %1078 = vst.msk [vmem:[%s509_s19] sm:$0xff] %vm531_vm0, %v1077_v21 }
 0x7b6   : > { %1506 = shalt.err (!%p1503_p9)
}
 0x7b7   : > { %1301 = dma.vmem_to_hbm [thread:$0]  (%p1697_p4), %s1093_s17, 128, %s1095_s14, %s1080_s28  }
 0x7b8 PF: > { %p1318_p10 = scmp.ge.s32.totalorder %s1565_s30, 2  ;;  %s1106_s23 = sand.u32 1, %s1545_s25  }
 0x7b9   : > { %s1107_s19 = scalar_lea.sflag [#allocation8], %s1106_s23 }
 0x7ba   : > { %p1311_p11 = pnand %p1318_p10, %p1704_p8 }
 0x7bc   : > { %p1312_p12 = pneg %p1311_p11 }
 0x7be   : > { %1540 = dma.done.wait (%p1312_p12), %s1107_s19, 128  }
 0x7bf   : > { %1542 = vsyncadd (%p1312_p12), %s1107_s19, 4294967168  ;;  %s28_s30 = sadd.s32 1, %s1565_s30   ;;  %s1902_s24 = sld [smem:[#allocation15_spill]] }
 0x7c0   : > { %p25_p13 = scmp.ge.s32.totalorder %s28_s30, 4   ;;  %s1903_s27 = sld [smem:[#allocation19_spill]] }
 0x7c1   : > { %s1904_s28 = sld [smem:[#allocation16_spill]]  ;;  %s1906_s25 = smov %s1549_s26 }
 0x7c2   : > { %s1905_s29 = sld [smem:[#allocation17_spill]]  ;;  %27 = sbr.rel (!%p25_p13) target bundleno = 6 (0x6), region = 131 }
 0x7c5   : > { %s1907_s26 = smov %s1902_s24 }
 0x7c7   :  { %1113 = vsyncpa [#allocation7], 1 }
 0x7c8   :  { %1115 = vsyncpa [#allocation7 + $0x1], 1 }
 0x7c9   :  { %1116 = vsyncpa [#allocation10], 1 }
 0x7ca   :  { %1117 = vsyncpa [#allocation8], 1 }
 0x7cb   :  { %1119 = vsyncpa [#allocation8 + $0x1], 1 }

</bundles_post_ra>
